<compile_context>
chip_gen: v5e
topology: v5e:2x2
jax: 0.10.0
libtpu: 0.0.40
codegen_flags: <defaults>
</compile_context>

<pallas_src>
import functools

import numpy as np
import jax
import jax.numpy as jnp
from jax.experimental import pallas as pl
from jax.experimental.pallas import tpu as pltpu


# ----------------------------------------------------------------------------
# elementwise helpers (used inside kernels)
# ----------------------------------------------------------------------------
_SQRT1_2 = 0.7071067811865476


def _erf(x):
    # TODO(synk): lax.erf may not lower in Mosaic; use Abramowitz-Stegun 7.1.26
    # polynomial (<= 1.5e-7 abs error) so exact-gelu semantics hold to f32 tolerance.
    p = 0.3275911
    a1, a2, a3, a4, a5 = 0.254829592, -0.284496736, 1.421413741, -1.453152027, 1.061405429
    s = jnp.where(x >= 0.0, 1.0, -1.0)
    ax = jnp.abs(x)
    t = 1.0 / (1.0 + p * ax)
    poly = ((((a5 * t + a4) * t + a3) * t + a2) * t + a1) * t
    return s * (1.0 - poly * jnp.exp(-ax * ax))


def _gelu(x):
    # PyTorch F.gelu default ('none') = 0.5 * x * (1 + erf(x / sqrt(2)))
    return 0.5 * x * (1.0 + _erf(x * _SQRT1_2))


# ----------------------------------------------------------------------------
# tile-size helpers
# ----------------------------------------------------------------------------
def _pick_row_tile(rows, target=1024):
    """Largest multiple-of-8 divisor of `rows` that is <= target (else whole array)."""
    if rows <= target:
        return rows
    for cand in range(target, 7, -1):
        if rows % cand == 0 and cand % 8 == 0:
            return cand
    return rows


def _pick_batch_tile(batch, n, c, max_bytes=2 << 20, cap=8):
    """Batch elements per Fourier-layer grid step, keeping the block <= ~2 MiB."""
    limit = max(1, max_bytes // (n * c * 4))
    best = 1
    for cand in range(1, min(batch, cap, limit) + 1):
        if batch % cand == 0 and ((cand * n) % 8 == 0 or cand == batch):
            best = cand
    if (best * n) % 8 != 0 and best != batch:
        best = batch  # fall back to a single full block (always layout-legal)
    return best


# ----------------------------------------------------------------------------
# row-tiled dense (nn.Linear) kernel: y = x @ W + b, optionally followed by gelu
# ----------------------------------------------------------------------------
def _dense_kernel(x_ref, w_ref, b_ref, o_ref, *, apply_gelu):
    y = jnp.dot(x_ref[...], w_ref[...], preferred_element_type=jnp.float32) + b_ref[...]
    if apply_gelu:
        y = _gelu(y)
    o_ref[...] = y


def dense(x, w, b, apply_gelu=False, row_tile=1024):
    rows, cin = x.shape
    cout = w.shape[1]
    rt = _pick_row_tile(rows, row_tile)
    return pl.pallas_call(
        functools.partial(_dense_kernel, apply_gelu=apply_gelu),
        out_shape=jax.ShapeDtypeStruct((rows, cout), jnp.float32),
        grid=(rows // rt,),
        in_specs=[
            pl.BlockSpec((rt, cin), lambda g: (g, 0)),
            pl.BlockSpec((cin, cout), lambda g: (0, 0)),
            pl.BlockSpec((1, cout), lambda g: (0, 0)),
        ],
        out_specs=pl.BlockSpec((rt, cout), lambda g: (g, 0)),
        compiler_params=pltpu.CompilerParams(dimension_semantics=("parallel",)),
    )(x, w, b)


# ----------------------------------------------------------------------------
# fused projection head: fc2( gelu( fc1(x) ) )  on row tiles
# (avoids writing the (B*N, 128) intermediate back to HBM)
# ----------------------------------------------------------------------------
def _head_kernel(x_ref, w1_ref, b1_ref, w2_ref, b2_ref, o_ref):
    h = jnp.dot(x_ref[...], w1_ref[...], preferred_element_type=jnp.float32) + b1_ref[...]
    h = _gelu(h)
    # Final output is a 1-wide column (tiny); it is reshaped to (B, S) outside.
    o_ref[...] = jnp.dot(h, w2_ref[...], preferred_element_type=jnp.float32) + b2_ref[...]


def head(x, w1, b1, w2, b2, row_tile=1024):
    rows, cin = x.shape
    chid = w1.shape[1]
    cout = w2.shape[1]
    rt = _pick_row_tile(rows, row_tile)
    return pl.pallas_call(
        _head_kernel,
        out_shape=jax.ShapeDtypeStruct((rows, cout), jnp.float32),
        grid=(rows // rt,),
        in_specs=[
            pl.BlockSpec((rt, cin), lambda g: (g, 0)),
            pl.BlockSpec((cin, chid), lambda g: (0, 0)),
            pl.BlockSpec((1, chid), lambda g: (0, 0)),
            pl.BlockSpec((chid, cout), lambda g: (0, 0)),
            pl.BlockSpec((1, cout), lambda g: (0, 0)),
        ],
        out_specs=pl.BlockSpec((rt, cout), lambda g: (g, 0)),
        compiler_params=pltpu.CompilerParams(dimension_semantics=("parallel",)),
    )(x, w1, b1, w2, b2)


# ----------------------------------------------------------------------------
# Fourier layer kernel: gelu( SpectralConv1d(x) + Conv1d(width, width, 1)(x) )
# channels-last rows; one grid step handles `bt` batch elements (bt*n rows).
# ----------------------------------------------------------------------------
def _fourier_layer_kernel(x_ref, dftT_ref, idftT_ref, wmix_ref, wcT_ref, bc_ref,
                          o_ref, *, bt, n, c, m):
    A = x_ref[...]                                                   # (bt*n, c)
    dftT = dftT_ref[...]                                             # (2m, n) rows: [cos ; -sin]
    idftT = idftT_ref[...]                                           # (n, 2m) cols: [icos | -isin]
    wmix = wmix_ref[...]                                             # (m, 2c, 2c)

    # pointwise 1x1 conv on the whole block: one big MXU matmul
    Z = jnp.dot(A, wcT_ref[...], preferred_element_type=jnp.float32) + bc_ref[...]

    # truncated rfft (matmul over the spatial axis) per batch element,
    # packed into (m, bt, 2c):  [.., :c] = Re(X),  [.., c:] = Im(X)
    xg_parts = []
    for b in range(bt):
        A_b = A[b * n:(b + 1) * n, :]                                # (n, c)
        Xf_b = jnp.dot(dftT, A_b, preferred_element_type=jnp.float32)  # (2m, c)
        xg_parts.append(jnp.concatenate([Xf_b[:m, :], Xf_b[m:, :]], axis=1))  # (m, 2c)
    Xg = jnp.stack(xg_parts, axis=1)                                 # (m, bt, 2c)

    # complex channel mix for all modes / batch elements at once:
    # single batched matmul (m, bt, 2c) @ (m, 2c, 2c) -> (m, bt, 2c)
    Yg = jax.lax.dot_general(
        Xg, wmix,
        dimension_numbers=(((2,), (1,)), ((0,), (0,))),
        preferred_element_type=jnp.float32)

    # inverse truncated rfft per batch element, add conv path, gelu, store
    for b in range(bt):
        Yg_b = Yg[:, b, :]                                           # (m, 2c)
        Ycat_b = jnp.concatenate([Yg_b[:, :c], Yg_b[:, c:]], axis=0)  # (2m, c) = [Yr ; Yi]
        S_b = jnp.dot(idftT, Ycat_b, preferred_element_type=jnp.float32)  # (n, c)
        o_ref[b * n:(b + 1) * n, :] = _gelu(Z[b * n:(b + 1) * n, :] + S_b)


def fourier_layer(h, dftT, idftT, wmix, wcT, bc_row, *, batch, n, c, m):
    bt = _pick_batch_tile(batch, n, c)
    kernel = functools.partial(_fourier_layer_kernel, bt=bt, n=n, c=c, m=m)
    return pl.pallas_call(
        kernel,
        out_shape=jax.ShapeDtypeStruct((batch * n, c), jnp.float32),
        grid=(batch // bt,),
        in_specs=[
            pl.BlockSpec((bt * n, c), lambda g: (g, 0)),
            pl.BlockSpec((2 * m, n), lambda g: (0, 0)),
            pl.BlockSpec((n, 2 * m), lambda g: (0, 0)),
            pl.BlockSpec((m, 2 * c, 2 * c), lambda g: (0, 0, 0)),
            pl.BlockSpec((c, c), lambda g: (0, 0)),
            pl.BlockSpec((1, c), lambda g: (0, 0)),
        ],
        out_specs=pl.BlockSpec((bt * n, c), lambda g: (g, 0)),
        compiler_params=pltpu.CompilerParams(dimension_semantics=("parallel",)),
    )(h, dftT, idftT, wmix, wcT, bc_row)


# ----------------------------------------------------------------------------
# basis matrices for the truncated real DFT / inverse (irfft semantics)
# ----------------------------------------------------------------------------
def make_dft_basis(n_spatial, modes):
    n = np.arange(n_spatial)[:, None].astype(np.float64)
    k = np.arange(modes)[None, :].astype(np.float64)
    ang = 2.0 * np.pi * n * k / n_spatial                            # (N, M)
    cos, sin = np.cos(ang), np.sin(ang)
    # forward: Xf = dftT @ x_b gives [Re(rfft) ; Im(rfft)] for the first `modes` bins
    dftT = np.concatenate([cos.T, -sin.T], axis=0).astype(np.float32)   # (2M, N)
    # inverse (irfft with only modes <= N//2 populated; DC imaginary part discarded)
    coef = (np.where(np.arange(modes) == 0, 1.0, 2.0) / n_spatial)[None, :]
    idftT = np.concatenate([coef * cos, -(coef * sin)], axis=1).astype(np.float32)  # (N, 2M)
    return jnp.asarray(dftT), jnp.asarray(idftT)


# ----------------------------------------------------------------------------
# deterministic parameter init (shapes follow the torch module __init__)
# ----------------------------------------------------------------------------
def init_params(key, modes, width, nlayers):
    def uniform(k, shape, lo, hi):
        return jax.random.uniform(k, shape, jnp.float32, lo, hi)

    ks = jax.random.split(key, 4 + nlayers)
    p = {}

    k0 = 1.0 / np.sqrt(2.0)                       # fc0: Linear(2, width)
    ka, kb = jax.random.split(ks[0])
    p["w0"] = uniform(ka, (2, width), -k0, k0)
    p["b0"] = uniform(kb, (1, width), -k0, k0)

    layers = []
    for i in range(nlayers):
        k1, k2, k3, k4 = jax.random.split(ks[1 + i], 4)
        scale = 1.0 / (width * width)             # SpectralConv1d: scale * rand(cfloat)
        wr = scale * jax.random.uniform(k1, (modes, width, width), jnp.float32)
        wi = scale * jax.random.uniform(k2, (modes, width, width), jnp.float32)
        kc = 1.0 / np.sqrt(width)                 # Conv1d(width, width, 1)
        wc = uniform(k3, (width, width), -kc, kc)
        bc = uniform(k4, (width, 1), -kc, kc)
        layers.append({"wr": wr, "wi": wi, "wc": wc, "bc": bc})
    p["layers"] = layers

    k1s = 1.0 / np.sqrt(width)                    # fc1: Linear(width, 128)
    ka, kb = jax.random.split(ks[1 + nlayers])
    p["w1"] = uniform(ka, (width, 128), -k1s, k1s)
    p["b1"] = uniform(kb, (1, 128), -k1s, k1s)

    k2s = 1.0 / np.sqrt(128.0)                    # fc2: Linear(128, 1)
    ka, kb = jax.random.split(ks[2 + nlayers])
    p["w2"] = uniform(ka, (128, 1), -k2s, k2s)
    p["b2"] = uniform(kb, (1, 1), -k2s, k2s)
    return p


def prepare_kernel_params(params, modes, width, s):
    """Host-side preprocessing of weights into kernel-ready layouts."""
    assert modes <= s // 2, "kernel assumes modes <= N//2 (no Nyquist bin)"
    dftT, idftT = make_dft_basis(s, modes)
    kp = {"dftT": dftT, "idftT": idftT,
          "w0": params["w0"], "b0": params["b0"],
          "w1": params["w1"], "b1": params["b1"],
          "w2": params["w2"], "b2": params["b2"],
          "layers": []}
    for lyr in params["layers"]:
        wrT = jnp.transpose(lyr["wr"], (0, 2, 1))          # (m, i, o)
        wiT = jnp.transpose(lyr["wi"], (0, 2, 1))
        # combined real/imag mix so [Xr|Xi] @ wmix[m] = [Yr|Yi]
        wmix = jnp.concatenate(
            [jnp.concatenate([wrT, wiT], axis=2),
             jnp.concatenate([-wiT, wrT], axis=2)], axis=1)  # (m, 2c, 2c)
        kp["layers"].append({"wmix": wmix,
                             "wcT": jnp.transpose(lyr["wc"]),
                             "bc_row": lyr["bc"].reshape(1, width)})
    return kp


# ----------------------------------------------------------------------------
# FNO1d forward (Pallas) and a pure-JAX reference
# ----------------------------------------------------------------------------
def fno1d_forward(x, kparams, modes, width):
    B, S = x.shape
    grid = jnp.linspace(0.0, 1.0, S, dtype=jnp.float32)
    xin = jnp.stack([x, jnp.broadcast_to(grid, (B, S))], axis=-1).reshape(B * S, 2)

    # fc0 lift: rows stay channels-last (b, s) -> no transposes around the stack
    h = dense(xin, kparams["w0"], kparams["b0"])                     # (B*S, width)

    # TODO(synk): padding != 0 branch (F.pad + crop) not implemented; module default is 0.
    for lyr in kparams["layers"]:
        h = fourier_layer(h, kparams["dftT"], kparams["idftT"],
                          lyr["wmix"], lyr["wcT"], lyr["bc_row"],
                          batch=B, n=S, c=width, m=modes)

    y = head(h, kparams["w1"], kparams["b1"], kparams["w2"], kparams["b2"])  # (B*S, 1)
    return y.reshape(B, S)


def fno1d_reference(x, params, modes, width):
    B, S = x.shape
    grid = jnp.broadcast_to(jnp.linspace(0.0, 1.0, S, dtype=jnp.float32), (B, S))
    h = jnp.stack([x, grid], axis=-1)
    h = h @ params["w0"] + params["b0"]
    h = jnp.transpose(h, (0, 2, 1))                                   # (B, C, S)
    for layer in params["layers"]:
        xf = jnp.fft.rfft(h, axis=-1)                                 # (B, C, S//2+1)
        w_cplx = layer["wr"] + 1j * layer["wi"]                       # (M, O, I)
        ym = jnp.einsum("moi,bim->bom", w_cplx, xf[:, :, :modes])
        out_ft = jnp.zeros((B, width, S // 2 + 1), dtype=xf.dtype).at[:, :, :modes].set(ym)
        spec = jnp.fft.irfft(out_ft, n=S, axis=-1)
        pw = jnp.einsum("oi,bin->bon", layer["wc"], h) + layer["bc"][None, :, :]
        h = jax.nn.gelu(spec + pw, approximate=False)
    h = jnp.transpose(h, (0, 2, 1))
    h = jax.nn.gelu(h @ params["w1"] + params["b1"], approximate=False)
    h = h @ params["w2"] + params["b2"]
    return h[..., 0]


if __name__ == "__main__":
    MODES, WIDTH, NLAYERS = 4, 8, 4
    B, S = 2, 16

    key = jax.random.PRNGKey(0)
    kx, kp_key = jax.random.split(key)
    x = jax.random.normal(kx, (B, S), dtype=jnp.float32)

    params = init_params(kp_key, MODES, WIDTH, NLAYERS)
    kparams = prepare_kernel_params(params, MODES, WIDTH, S)

    out = fno1d_forward(x, kparams, MODES, WIDTH)
    out = jax.block_until_ready(out)
    assert out.shape == (B, S)

    ref = fno1d_reference(x, params, MODES, WIDTH)
    np.testing.assert_allclose(np.asarray(out), np.asarray(ref), atol=1e-3, rtol=1e-3)

    print("KERNEL_OK")
</pallas_src>

<mosaic_0001>
module attributes {stable_mosaic.version = 11 : i64} {
  func.func @_dense_kernel(%arg0: i32, %arg1: memref<32x2xf32, #tpu.memory_space<vmem>>, %arg2: memref<2x8xf32, #tpu.memory_space<vmem>>, %arg3: memref<1x8xf32, #tpu.memory_space<vmem>>, %arg4: memref<32x8xf32, #tpu.memory_space<vmem>>) attributes {dimension_semantics = [#tpu.dimension_semantics<parallel>], iteration_bounds = array<i64: 1>, scalar_prefetch = 0 : i64, scratch_operands = 0 : i64, tpu.core_type = #tpu.core_type<tc>, window_params = [{transform_indices = @transform_0, window_bounds = array<i64: 32, 2>}, {pipeline_mode = #tpu.pipeline_mode<synchronous>, transform_indices = @transform_1, window_bounds = array<i64: 2, 8>}, {pipeline_mode = #tpu.pipeline_mode<synchronous>, transform_indices = @transform_2, window_bounds = array<i64: 1, 8>}, {transform_indices = @transform_3, window_bounds = array<i64: 32, 8>}]} {
    %c0 = arith.constant 0 : index
    %c0_0 = arith.constant 0 : index
    %0 = vector.load %arg1[%c0, %c0_0] : memref<32x2xf32, #tpu.memory_space<vmem>>, vector<32x2xf32>
    %c0_1 = arith.constant 0 : index
    %c0_2 = arith.constant 0 : index
    %1 = vector.load %arg2[%c0_1, %c0_2] : memref<2x8xf32, #tpu.memory_space<vmem>>, vector<2x8xf32>
    %cst = arith.constant dense<0.000000e+00> : vector<32x8xf32>
    %2 = tpu.matmul %0, %1, %cst {dimension_numbers = #tpu.dot_dimension_numbers<[1], [0], [0], [1], [0, 0, 1, 1], [], []>} : vector<32x2xf32>, vector<2x8xf32>, vector<32x8xf32> -> vector<32x8xf32>
    %c0_3 = arith.constant 0 : index
    %c0_4 = arith.constant 0 : index
    %3 = vector.load %arg3[%c0_3, %c0_4] : memref<1x8xf32, #tpu.memory_space<vmem>>, vector<1x8xf32>
    %4 = vector.broadcast %3 : vector<1x8xf32> to vector<32x8xf32>
    %5 = arith.addf %2, %4 : vector<32x8xf32>
    %c0_5 = arith.constant 0 : index
    %c0_6 = arith.constant 0 : index
    %6 = vector.load %arg4[%c0_5, %c0_6] : memref<32x8xf32, #tpu.memory_space<vmem>>, vector<32x8xf32>
    tpu.vector_store %arg4[%c0_5, %c0_6], %5 {strides = array<i32>} : memref<32x8xf32, #tpu.memory_space<vmem>>, vector<32x8xf32>,
    return
  }
  func.func @transform_0(%arg0: i32) -> (i32, i32) {
    %c0_i32 = arith.constant 0 : i32
    %c0_i32_0 = arith.constant 0 : i32
    return %arg0, %c0_i32 : i32, i32
  }
  func.func @transform_1(%arg0: i32) -> (i32, i32) {
    %c0_i32 = arith.constant 0 : i32
    %c0_i32_0 = arith.constant 0 : i32
    %c0_i32_1 = arith.constant 0 : i32
    return %c0_i32, %c0_i32_0 : i32, i32
  }
  func.func @transform_2(%arg0: i32) -> (i32, i32) {
    %c0_i32 = arith.constant 0 : i32
    %c0_i32_0 = arith.constant 0 : i32
    %c0_i32_1 = arith.constant 0 : i32
    return %c0_i32, %c0_i32_0 : i32, i32
  }
  func.func @transform_3(%arg0: i32) -> (i32, i32) {
    %c0_i32 = arith.constant 0 : i32
    %c0_i32_0 = arith.constant 0 : i32
    return %arg0, %c0_i32 : i32, i32
  }
}

</mosaic_0001>

<bundles_post_ra>
// kernel: tpu_custom_call.1
= control target key start
LH: loop header
LB: loop body
LE: loop exit
PB: predicated region body
PF: predicated region fallthrough
CT: control target
= control target key end

     0   :  { %vm36_vm0 = vcmask 1041408   ;;  %vm23_vm1 = vcmask 15360   ;;  %vm69_vm2 = vcmask 64512   ;;  %s137_s1 = inlined_call_operand.vmem [shape: f32[2,8], index: 1, kind: input, shape index: {}]   ;;  %s138_s0 = inlined_call_operand.vmem [shape: f32[32,2], index: 0, kind: input, shape index: {}]   ;;  %s139_s2 = inlined_call_operand.vmem [shape: f32[1,8], index: 2, kind: input, shape index: {}]   ;;  %s140_s3 = inlined_call_operand.vmem [shape: f32[32,8], index: 3, kind: output, shape index: {}]  }
   0x1   :  { %v18_v0 = vld [vmem:[%s137_s1] sm:$0x3]  ;;  %v16_v1 = vld [vmem:[%s138_s0 + $0x10] sm:$0xff]  ;;  %v17_v2 = vld [vmem:[%s138_s0 + $0x18] sm:$0xff] }
   0x2   :  { %84 = vmatpush.msk.msra.mxu2 %vm36_vm0, %v18_v0  ;;  %85 = vmatpush.msk.msra.mxu3 %vm36_vm0, %v18_v0  ;;  %v14_v3 = vld [vmem:[%s138_s0] sm:$0xff]  ;;  %v15_v4 = vld [vmem:[%s138_s0 + $0x8] sm:$0xff] }
   0x3   :  { %81 = vmatmul.msk.f32.vlgmr.msra.gmra.mxu2 %vm23_vm1, %v16_v1  ;;  %82 = vmatmul.msk.f32.vlgmr.msra.gmra.mxu3 %vm23_vm1, %v17_v2  ;;  %v86_v5 = vld [vmem:[%s139_s2] ss:$0 sm:$0xff] }
   0x4   :  { %78 = vmatpush.msk.msra.mxu0 %vm36_vm0, %v18_v0  ;;  %83 = vmatpush.msk.msra.mxu1 %vm36_vm0, %v18_v0 }
   0x5   :  { %79 = vmatmul.msk.f32.vlgmr.msra.gmra.mxu0 %vm23_vm1, %v14_v3  ;;  %80 = vmatmul.msk.f32.vlgmr.msra.gmra.mxu1 %vm23_vm1, %v15_v4 }
  0x82   :  { %v57_v6 = vpop.f32.mrf.mxu0  ;;  %v60_v7 = vpop.f32.mrf.mxu1 }
  0x83   :  { %v58_v8 = vadd.f32 %v86_v5, %v57_v6  ;;  %v61_v9 = vadd.f32 %v86_v5, %v60_v7 }
  0x85   :  { %70 = vst.msk [vmem:[%s140_s3] sm:$0xff] %vm69_vm2, %v58_v8 }
  0x86   :  { %71 = vst.msk [vmem:[%s140_s3 + $0x8] sm:$0xff] %vm69_vm2, %v61_v9  ;;  %v63_v10 = vpop.f32.mrf.mxu2  ;;  %v66_v11 = vpop.f32.mrf.mxu3 }
  0x87   :  { %v64_v12 = vadd.f32 %v86_v5, %v63_v10  ;;  %v67_v13 = vadd.f32 %v86_v5, %v66_v11 }
  0x89   :  { %72 = vst.msk [vmem:[%s140_s3 + $0x10] sm:$0xff] %vm69_vm2, %v64_v12 }
  0x8a   :  { %73 = vst.msk [vmem:[%s140_s3 + $0x18] sm:$0xff] %vm69_vm2, %v67_v13 }

</bundles_post_ra>
